<compile_context>
chip_gen: v6e
topology: v6e:2x2x1
jax: 0.10.0
libtpu: 0.0.40
codegen_flags: <defaults>
</compile_context>

<pallas_src>
import functools

import jax
import jax.numpy as jnp
from jax.experimental import pallas as pl
from jax.experimental.pallas import tpu as pltpu

_TR_MAX = 256        # row tile (sublane axis), multiple of 8
_TK_MAX = 2048       # spatial tile (lane axis), multiple of 128
_COLS_MAX = 8192     # max lane width of the folded slab
_ROWS_TARGET = 1024  # want >= this many rows (>= 2 row tiles per TC on v7x)


def _round_up(x: int, m: int) -> int:
    return ((x + m - 1) // m) * m


def _choose_cols(rows: int, hw: int) -> int:
    """Pick the lane width of the (rows*F, hw/F) slab.  Must divide hw so the
    reshape is a free view and (n, c) boundaries are preserved."""
    cands = [c for c in range(128, min(hw, _COLS_MAX) + 1, 128) if hw % c == 0]
    if not cands:
        return hw  # ragged fallback: one spatial row per (n, c), masked in-kernel
    wide = [c for c in cands if c >= 1024] or cands
    big = [c for c in wide if rows * (hw // c) >= _ROWS_TARGET]
    if big:
        return max(big)   # widest lanes that still leave plenty of row tiles
    return min(wide)      # otherwise maximize rows among acceptable widths


def _focal_loss_kernel(logits_ref, targets_ref, out_ref, acc_ref, *,
                       alpha: float, gamma: int, tk: int, true_cols: int,
                       mask_cols: bool):
    k = pl.program_id(1)

    @pl.when(k == 0)
    def _():
        acc_ref[...] = jnp.zeros_like(acc_ref)

    # Inputs arrive in their HBM dtype (f32 or bf16); all math is f32.
    x = logits_ref[...].astype(jnp.float32)
    y = targets_ref[...].astype(jnp.float32)

    # One shared exp for both sigmoid and the stable BCE-with-logits term.
    e = jnp.exp(-jnp.abs(x))                    # exp(-|x|)
    s = pl.reciprocal(1.0 + e, approx=True)     # ~1 / (1 + exp(-|x|)) (EUP)
    p = jnp.where(x >= 0.0, s, e * s)           # sigmoid(x)

    # binary_cross_entropy_with_logits (reduction='none'), stable form:
    #   max(x, 0) - x*y + log(1 + exp(-|x|))
    ce = jnp.maximum(x, 0.0) - x * y + jnp.log1p(e)

    # 1 - p_t = p + y - 2*p*y   (exact for soft targets too)
    one_minus_pt = p + y - 2.0 * (p * y)
    f = ce * one_minus_pt ** gamma              # gamma: Python int -> integer_pow
    if alpha >= 0.0:
        # alpha_t = alpha*y + (1-alpha)*(1-y) = (1-alpha) + (2*alpha-1)*y
        f = ((1.0 - alpha) + (2.0 * alpha - 1.0) * y) * f

    if mask_cols:
        # Ragged spatial tail: zero out-of-bounds lanes before reducing.
        col = jax.lax.broadcasted_iota(jnp.int32, f.shape, 1) + k * tk
        f = jnp.where(col < true_cols, f, 0.0)
    # (Out-of-bounds *rows* need no mask: their output rows are write-dropped.)

    # Lane-dense accumulation: fold the tile's lanes into 128-wide chunks with
    # aligned static slices (no relayout) and plain full-vreg VPU adds.
    nch = f.shape[1] // 128
    part = f[:, 0:128]
    for c in range(1, nch):
        part = part + f[:, c * 128:(c + 1) * 128]
    acc_ref[...] += part

    @pl.when(k == pl.num_programs(1) - 1)
    def _():
        # Single XLU lane reduction + narrow store per row tile.
        out_ref[...] = jnp.sum(acc_ref[...], axis=-1, keepdims=True)


def sigmoid_focal_loss(map_seg_e, map_seg_gt, *, alpha: float = -1.0,
                       gamma: int = 2, reduction: str = "mean"):
    """Pallas implementation of SigmoidFocalLoss.forward (NCHW inputs)."""
    assert map_seg_e.shape == map_seg_gt.shape
    N, C, H, W = map_seg_e.shape
    rows, hw = N * C, H * W

    cols = _choose_cols(rows, hw)
    fold = hw // cols
    R = rows * fold

    # Free reshapes (views); dtypes are passed through untouched (cast in-kernel).
    logits2d = map_seg_e.reshape(R, cols)
    targets2d = map_seg_gt.reshape(R, cols)

    tr = min(_TR_MAX, _round_up(R, 8))
    tk = min(_TK_MAX, _round_up(cols, 128))
    grid = (pl.cdiv(R, tr), pl.cdiv(cols, tk))

    kernel = functools.partial(
        _focal_loss_kernel, alpha=float(alpha), gamma=int(gamma),
        tk=tk, true_cols=cols, mask_cols=(cols % tk != 0))

    row_sums = pl.pallas_call(
        kernel,
        out_shape=jax.ShapeDtypeStruct((R, 1), jnp.float32),
        grid_spec=pltpu.PrefetchScalarGridSpec(
            num_scalar_prefetch=0,
            grid=grid,
            in_specs=[
                pl.BlockSpec((tr, tk), lambda r, k: (r, k)),
                pl.BlockSpec((tr, tk), lambda r, k: (r, k)),
            ],
            out_specs=pl.BlockSpec((tr, 1), lambda r, k: (r, 0)),
            scratch_shapes=[pltpu.VMEM((tr, 128), jnp.float32)],
        ),
        compiler_params=pltpu.CompilerParams(
            dimension_semantics=("parallel", "arbitrary"),
            vmem_limit_bytes=32 * 1024 * 1024,
        ),
    )(logits2d, targets2d)

    row_sums = row_sums[:, 0]   # (R,) per-sub-row spatial sums

    if reduction == "mean":
        return jnp.sum(row_sums) / jnp.float32(N * C * H * W)
    elif reduction == "sum":
        return jnp.sum(row_sums)
    elif reduction == "sum_of_class_means":
        # mean over dims [0, 2, 3] then sum over classes
        per_nc = row_sums.reshape(N, C, fold).sum(axis=2)      # (N, C) spatial sums
        return jnp.sum(per_nc.mean(axis=0) / jnp.float32(hw))
    else:
        # TODO(synk): PyTorch reduction='none' returns the per-element loss map;
        # this fallback only returns per-(n, c) spatial sums.
        return row_sums.reshape(N, C, fold).sum(axis=2)


def _reference_jax(map_seg_e, map_seg_gt, alpha, gamma, reduction):
    x = map_seg_e.astype(jnp.float32)
    y = map_seg_gt.astype(jnp.float32)
    p = jax.nn.sigmoid(x)
    ce = jnp.maximum(x, 0.0) - x * y + jnp.log1p(jnp.exp(-jnp.abs(x)))
    p_t = p * y + (1.0 - p) * (1.0 - y)
    f = ce * (1.0 - p_t) ** gamma
    if alpha >= 0:
        f = (alpha * y + (1 - alpha) * (1 - y)) * f
    if reduction == "mean":
        return f.mean()
    elif reduction == "sum":
        return f.sum()
    elif reduction == "sum_of_class_means":
        return f.mean(axis=(0, 2, 3)).sum()
    return f


if __name__ == "__main__":
    key = jax.random.PRNGKey(0)

    def run_case(shape, logits_dtype, reductions, alphas, key):
        k1, k2, key = jax.random.split(key, 3)
        logits = (jax.random.normal(k1, shape, dtype=jnp.float32) * 2.0)
        logits = logits.astype(logits_dtype)
        targets = (jax.random.uniform(k2, shape) > 0.5).astype(jnp.float32)
        for reduction in reductions:
            for alpha in alphas:
                out = sigmoid_focal_loss(logits, targets, alpha=alpha, gamma=2,
                                         reduction=reduction)
                out = jax.block_until_ready(out)
                ref = _reference_jax(logits, targets, alpha, 2, reduction)
                # rtol loosened vs pure-f32: pl.reciprocal(approx=True) trades
                # ~1e-4 relative error in sigmoid for a free-ish EUP slot.
                assert jnp.allclose(out, ref, rtol=5e-3, atol=1e-6), (
                    shape, str(logits_dtype), reduction, alpha,
                    float(out), float(ref))
        return key

    # Small shapes, all reduction/alpha combos.
    for shape in [(2, 4, 16, 16),     # single tile, aligned
                  (2, 3, 15, 17),     # ragged hw -> in-kernel column mask
                  (2, 4, 128, 128)]:  # spatial folded into rows (F>1)
        key = run_case(shape, jnp.float32,
                       ("mean", "sum", "sum_of_class_means"), (-1.0, 0.25), key)

    # bf16 logits passed straight through (upcast happens inside the kernel).
    key = run_case((2, 4, 32, 32), jnp.bfloat16, ("mean",), (0.25,), key)

    # Larger shape: fold + multiple row tiles + multi-step spatial accumulator.
    key = run_case((4, 16, 256, 256), jnp.float32,
                   ("mean", "sum_of_class_means"), (-1.0,), key)

    print("KERNEL_OK")
</pallas_src>

<mosaic_0001>
module attributes {stable_mosaic.version = 11 : i64} {
  func.func @_focal_loss_kernel(%arg0: i32, %arg1: i32, %arg2: memref<16x128xf32, #tpu.memory_space<vmem>>, %arg3: memref<16x128xf32, #tpu.memory_space<vmem>>, %arg4: memref<16x1xf32, #tpu.memory_space<vmem>>, %arg5: memref<16x128xf32, #tpu.memory_space<vmem>>) attributes {dimension_semantics = [#tpu.dimension_semantics<parallel>, #tpu.dimension_semantics<arbitrary>], iteration_bounds = array<i64: 1, 1>, scalar_prefetch = 0 : i64, scratch_operands = 1 : i64, tpu.core_type = #tpu.core_type<tc>, window_params = [{transform_indices = @transform_0, window_bounds = array<i64: 16, 128>}, {transform_indices = @transform_1, window_bounds = array<i64: 16, 128>}, {transform_indices = @transform_2, window_bounds = array<i64: 16, 1>}]} {
    %c0_i32 = arith.constant 0 : i32
    %0 = arith.cmpi eq, %arg1, %c0_i32 : i32
    %1 = arith.extui %0 : i1 to i32
    %c0_i32_0 = arith.constant 0 : i32
    %2 = arith.cmpi ne, %1, %c0_i32_0 : i32
    scf.if %2 {
      %cst_14 = arith.constant 0.000000e+00 : f32
      %35 = vector.broadcast %cst_14 : f32 to vector<16x128xf32>
      %c0_15 = arith.constant 0 : index
      %c0_16 = arith.constant 0 : index
      %36 = vector.load %arg5[%c0_15, %c0_16] : memref<16x128xf32, #tpu.memory_space<vmem>>, vector<16x128xf32>
      tpu.vector_store %arg5[%c0_15, %c0_16], %35 {strides = array<i32>} : memref<16x128xf32, #tpu.memory_space<vmem>>, vector<16x128xf32>,
    } else {
    }
    %c0 = arith.constant 0 : index
    %c0_1 = arith.constant 0 : index
    %3 = vector.load %arg2[%c0, %c0_1] : memref<16x128xf32, #tpu.memory_space<vmem>>, vector<16x128xf32>
    %c0_2 = arith.constant 0 : index
    %c0_3 = arith.constant 0 : index
    %4 = vector.load %arg3[%c0_2, %c0_3] : memref<16x128xf32, #tpu.memory_space<vmem>>, vector<16x128xf32>
    %5 = math.absf %3 : vector<16x128xf32>
    %cst = arith.constant 0.000000e+00 : f32
    %6 = vector.broadcast %cst : f32 to vector<16x128xf32>
    %7 = arith.subf %6, %5 : vector<16x128xf32>
    %8 = math.exp %7 : vector<16x128xf32>
    %cst_4 = arith.constant 1.000000e+00 : f32
    %9 = vector.broadcast %cst_4 : f32 to vector<16x128xf32>
    %10 = arith.addf %9, %8 : vector<16x128xf32>
    %11 = tpu.reciprocal %10 {approx = true} : vector<16x128xf32> -> vector<16x128xf32>
    %cst_5 = arith.constant 0.000000e+00 : f32
    %12 = vector.broadcast %cst_5 : f32 to vector<16x128xf32>
    %13 = arith.cmpf oge, %3, %12 : vector<16x128xf32>
    %14 = arith.mulf %8, %11 : vector<16x128xf32>
    %15 = arith.select %13, %11, %14 : vector<16x128xi1>, vector<16x128xf32>
    %cst_6 = arith.constant 0.000000e+00 : f32
    %16 = vector.broadcast %cst_6 : f32 to vector<16x128xf32>
    %17 = arith.maximumf %3, %16 : vector<16x128xf32>
    %18 = arith.mulf %3, %4 : vector<16x128xf32>
    %19 = arith.subf %17, %18 : vector<16x128xf32>
    %20 = math.log1p %8 : vector<16x128xf32>
    %21 = arith.addf %19, %20 : vector<16x128xf32>
    %22 = arith.addf %15, %4 : vector<16x128xf32>
    %23 = arith.mulf %15, %4 : vector<16x128xf32>
    %cst_7 = arith.constant 2.000000e+00 : f32
    %24 = vector.broadcast %cst_7 : f32 to vector<16x128xf32>
    %25 = arith.mulf %24, %23 : vector<16x128xf32>
    %26 = arith.subf %22, %25 : vector<16x128xf32>
    %27 = arith.mulf %26, %26 : vector<16x128xf32>
    %28 = arith.mulf %21, %27 : vector<16x128xf32>
    %c0_8 = arith.constant 0 : index
    %c0_9 = arith.constant 0 : index
    %29 = vector.load %arg5[%c0_8, %c0_9] : memref<16x128xf32, #tpu.memory_space<vmem>>, vector<16x128xf32>
    %30 = arith.addf %29, %28 : vector<16x128xf32>
    %c0_10 = arith.constant 0 : index
    %c0_11 = arith.constant 0 : index
    %31 = vector.load %arg5[%c0_10, %c0_11] : memref<16x128xf32, #tpu.memory_space<vmem>>, vector<16x128xf32>
    tpu.vector_store %arg5[%c0_10, %c0_11], %30 {strides = array<i32>} : memref<16x128xf32, #tpu.memory_space<vmem>>, vector<16x128xf32>,
    %c0_i32_12 = arith.constant 0 : i32
    %32 = arith.cmpi eq, %arg1, %c0_i32_12 : i32
    %33 = arith.extui %32 : i1 to i32
    %c0_i32_13 = arith.constant 0 : i32
    %34 = arith.cmpi ne, %33, %c0_i32_13 : i32
    scf.if %34 {
      %c0_14 = arith.constant 0 : index
      %c0_15 = arith.constant 0 : index
      %35 = vector.load %arg5[%c0_14, %c0_15] : memref<16x128xf32, #tpu.memory_space<vmem>>, vector<16x128xf32>
      %cst_16 = arith.constant dense<0.000000e+00> : vector<16xf32>
      %36 = vector.multi_reduction <add>, %35, %cst_16 [1] : vector<16x128xf32> to vector<16xf32>
      %37 = vector.shape_cast %36 : vector<16xf32> to vector<16x1xf32>
      %c0_17 = arith.constant 0 : index
      %c0_18 = arith.constant 0 : index
      %38 = vector.load %arg4[%c0_17, %c0_18] : memref<16x1xf32, #tpu.memory_space<vmem>>, vector<16x1xf32>
      tpu.vector_store %arg4[%c0_17, %c0_18], %37 {strides = array<i32>} : memref<16x1xf32, #tpu.memory_space<vmem>>, vector<16x1xf32>,
    } else {
    }
    return
  }
  func.func @transform_0(%arg0: i32, %arg1: i32) -> (i32, i32) {
    %c0_i32 = arith.constant 0 : i32
    return %arg0, %arg1 : i32, i32
  }
  func.func @transform_1(%arg0: i32, %arg1: i32) -> (i32, i32) {
    %c0_i32 = arith.constant 0 : i32
    return %arg0, %arg1 : i32, i32
  }
  func.func @transform_2(%arg0: i32, %arg1: i32) -> (i32, i32) {
    %c0_i32 = arith.constant 0 : i32
    %c0_i32_0 = arith.constant 0 : i32
    return %arg0, %c0_i32 : i32, i32
  }
}

</mosaic_0001>

<bundles_post_ra>
// kernel: tpu_custom_call.1
= control target key start
LH: loop header
LB: loop body
LE: loop exit
PB: predicated region body
PF: predicated region fallthrough
CT: control target
= control target key end

     0   :  { %7 = vsyncpa [#allocation4], 0  ;;  %s227_s0 = inlined_call_operand.hbm [shape: f32[16,128], index: 0, kind: input, shape index: {}]   ;;  %s228_s1 = inlined_call_operand.hbm [shape: f32[16,128], index: 1, kind: input, shape index: {}]   ;;  %s229_s2 = inlined_call_operand.vmem [shape: f32[16,1], index: 2, kind: output, shape index: {}]  }
   0x1   :  { %8 = vsyncpa [#allocation6], 0  ;;  %s189_s9 = smov [#allocation3]  }
   0x2   :  { %s14_s10 = sshll.u32 %s189_s9, 4  ;;  %s15_s10 = int_to_ptr.vmem [resolvable:$true] %s14_s10 }
   0x3   :  { %s153_s11 = scalar_lea.vmem %s15_s10, 256  ;;  %p158_p1 = scmp.lt.s32.totalorder %s15_s10, %s15_s10 }
   0x4   :  { %p154_p0 = scmp.ne.s32.totalorder %s15_s10, %s153_s11  ;;  %p159_p2 = scmp.lt.s32.totalorder %s153_s11, %s153_s11 }
   0x6   :  { %p160_p3 = por %p159_p2, %p158_p1 }
   0x8   :  { %p161_p4 = pnand %p160_p3, %p154_p0 }
   0xa   :  { %164 = shalt.err (!%p161_p4)
}
   0xb   :  { %s190_s12 = smov 128   ;;  %s191_s13 = smov 8  }
   0xc   :  { %20 = dma.hbm_to_vmem [thread:$0]  %s227_s0, 256, %s15_s10, [#allocation4], %s190_s12, %s190_s12, %s191_s13  }
   0xd   :  { %s192_s16 = smov [#allocation5]  }
   0xe   :  { %s26_s17 = sshll.u32 %s192_s16, 4  ;;  %s27_s17 = int_to_ptr.vmem [resolvable:$true] %s26_s17 }
   0xf   :  { %s173_s18 = scalar_lea.vmem %s27_s17, 256  ;;  %p178_p6 = scmp.lt.s32.totalorder %s27_s17, %s27_s17 }
  0x10   :  { %p174_p5 = scmp.ne.s32.totalorder %s27_s17, %s173_s18  ;;  %p179_p7 = scmp.lt.s32.totalorder %s173_s18, %s173_s18 }
  0x12   :  { %p180_p8 = por %p179_p7, %p178_p6 }
  0x14   :  { %p181_p9 = pnand %p180_p8, %p174_p5 }
  0x16   :  { %184 = shalt.err (!%p181_p9)
}
  0x17   :  { %32 = dma.hbm_to_vmem [thread:$0]  %s228_s1, 256, %s27_s17, [#allocation6], %s190_s12, %s190_s12, %s191_s13  }
  0x18   :  { %185 = dma.done.wait [#allocation4], 256  }
  0x19   :  { %186 = vsyncadd [#allocation4], 4294967040 }
  0x1a   :  { %187 = dma.done.wait [#allocation6], 256  }
  0x1b   :  { %188 = vsyncadd [#allocation6], 4294967040  ;;  %v45_v0 = vld [vmem:[#allocation3] sm:$0xff]  ;;  %v46_v1 = vld [vmem:[#allocation3 + $0x8] sm:$0xff]  ;;  %vm120_vm4 = vcmask 7168  }
  0x1c   :  { %v49_v2 = vand.u32 2147483647, %v45_v0  ;;  %v50_v3 = vand.u32 2147483647, %v46_v1  ;;  %v47_v15 = vld [vmem:[#allocation5] sm:$0xff]  ;;  %v67_v17 = vmax.f32 %v45_v0, 0.0 }
  0x1d   :  { %v69_v18 = vmul.f32 %v47_v15, %v45_v0  ;;  %vm61_vm0 = vcmp.ge.f32.partialorder %v45_v0, 0.0  ;;  %v48_v25 = vld [vmem:[#allocation5 + $0x8] sm:$0xff]  ;;  %vm62_vm1 = vcmp.ge.f32.partialorder %v46_v1, 0.0  ;;  %v68_v29 = vmax.f32 %v46_v1, 0.0 }
  0x1e   :  { %v51_v4 = vsub.f32 0.0, %v49_v2  ;;  %v52_v5 = vsub.f32 0.0, %v50_v3  ;;  %v70_v30 = vmul.f32 %v48_v25, %v46_v1 }
  0x1f   :  { %v71_v33 = vsub.f32 %v67_v17, %v69_v18 }
  0x20   :  { %v53_v6 = vmul.f32 1.442695, %v51_v4  ;;  %v55_v7 = vmul.f32 1.442695, %v52_v5  ;;  %v72_v42 = vsub.f32 %v68_v29, %v70_v30 }
  0x22   :  { %133 = vpow2.f32 %v53_v6 }
  0x23   :  { %135 = vpow2.f32 %v55_v7 }
  0x2f   :  { %v134_v8 = vpop.eup %133 }
  0x30   :  { %v136_v9 = vpop.eup %135  ;;  %v57_v10 = vadd.f32 1.0, %v134_v8  ;;  %v76_v12 = vmul.f32 -0.5, %v134_v8  ;;  %v79_v16 = vand.u32 2147483647, %v134_v8 }
  0x31   :  { %v58_v11 = vadd.f32 1.0, %v136_v9  ;;  %v85_v13 = vmul.f32 -0.5, %v136_v9  ;;  %v88_v21 = vand.u32 2147483647, %v136_v9 }
  0x32   :  { %137 = vrcp.f32 %v57_v10  ;;  %v77_v14 = vadd.f32 1.0, %v76_v12  ;;  %vm214_vm2 = vcmp.lt.f32.partialorder %v79_v16, 0.0004427343 }
  0x33   :  { %139 = vlog2.f32 %v57_v10  ;;  %v86_v19 = vadd.f32 1.0, %v85_v13  ;;  %vm89_vm3 = vcmp.lt.f32.partialorder %v88_v21, 0.0004427343 }
  0x34   :  { %141 = vrcp.f32 %v58_v11  ;;  %v78_v24 = vmul.f32 %v134_v8, %v77_v14 }
  0x35   :  { %143 = vlog2.f32 %v58_v11  ;;  %v87_v35 = vmul.f32 %v136_v9, %v86_v19 }
  0x3f   :  { %v138_v20 = vpop.eup %137 }
  0x40   :  { %v140_v22 = vpop.eup %139  ;;  %v63_v23 = vmul.f32 %v138_v20, %v134_v8 }
  0x41   :  { %v142_v26 = vpop.eup %141  ;;  %v75_v27 = vmul.f32 0.6931472, %v140_v22 }
  0x42   :  { %v144_v31 = vpop.eup %143  ;;  %v65_v32 = vsel %vm61_vm0, %v138_v20, %v63_v23  ;;  %v64_v34 = vmul.f32 %v142_v26, %v136_v9 }
  0x43   :  { %v93_v36 = vadd.f32 %v65_v32, %v47_v15  ;;  %v95_v37 = vmul.f32 %v65_v32, %v47_v15  ;;  %v84_v38 = vmul.f32 0.6931472, %v144_v31  ;;  %v81_v39 = vsel %vm214_vm2, %v78_v24, %v75_v27 }
  0x44   :  { %v66_v40 = vsel %vm62_vm1, %v142_v26, %v64_v34  ;;  %v91_v46 = vadd.f32 %v81_v39, %v71_v33 }
  0x45   :  { %v97_v41 = vmul.f32 2.0, %v95_v37  ;;  %v94_v43 = vadd.f32 %v66_v40, %v48_v25  ;;  %v96_v44 = vmul.f32 %v66_v40, %v48_v25  ;;  %v90_v45 = vsel %vm89_vm3, %v87_v35, %v84_v38 }
  0x46   :  { %v92_v50 = vadd.f32 %v90_v45, %v72_v42 }
  0x47   :  { %v99_v47 = vsub.f32 %v93_v36, %v97_v41  ;;  %v98_v48 = vmul.f32 2.0, %v96_v44 }
  0x49   :  { %v101_v49 = vmul.f32 %v99_v47, %v99_v47  ;;  %v100_v51 = vsub.f32 %v94_v43, %v98_v48 }
  0x4b   :  { %v103_v52 = vmul.f32 %v101_v49, %v91_v46  ;;  %v102_v53 = vmul.f32 %v100_v51, %v100_v51 }
  0x4d   :  { %116 = vadd.xlane.f32.xlu0 %v103_v52  ;;  %v104_v54 = vmul.f32 %v102_v53, %v92_v50 }
  0x51   :  { %118 = vadd.xlane.f32.xlu0 %v104_v54 }
  0xd6   :  { %v117_v55 = vpop.xlane.xlu0 %116 }
  0xd7   :  { %121 = vst.msk [vmem:[%s229_s2] sm:$0xff] %vm120_vm4, %v117_v55 }
  0xda   :  { %v119_v56 = vpop.xlane.xlu0 %118 }
  0xdb   :  { %122 = vst.msk [vmem:[%s229_s2 + $0x8] sm:$0xff] %vm120_vm4, %v119_v56 }
  0xdc   :  { %127 = vsyncpa [#allocation4], 1 }
  0xdd   :  { %128 = vsyncpa [#allocation6], 1 }

</bundles_post_ra>
